<compile_context>
chip_gen: v7x
topology: tpu7x:2x2x1
jax: 0.10.0
libtpu: 0.0.40
codegen_flags: <defaults>
</compile_context>

<pallas_src>
import functools

import jax
import jax.numpy as jnp
from jax.experimental import pallas as pl
from jax.experimental.pallas import tpu as pltpu

EPS = 1e-5          # nn.BatchNorm2d default eps
K = 4               # ConvTranspose2d kernel_size
LANES = 128
_VMEM_LIMIT = 32 * 1024 * 1024

# Output-parity tap table for ConvTranspose2d(kernel_size=4, stride=2, padding=1):
# output row oh = 2*i + parity receives input row i + dh through kernel row kh
# for (kh, dh) in _TAPS[parity] (identical table for the column axis).
_TAPS = {0: ((1, 0), (3, -1)),
         1: ((0, 1), (2, 0))}


# ----------------------------- Pallas kernels ------------------------------


def _mm_bn_stats_kernel(p_ref, w_ref, y_ref, s_ref, ss_ref):
    """ReLU -> phase matmul; emit per-tile per-channel sum / sum-of-squares.

    p_ref : (TR, Kc)  bf16 patch tile (current phase / row tile)
    w_ref : (Kc, Cp)  bf16 phase weights (resident across the row axis)
    y_ref : (TR, Cp)  bf16 pre-BatchNorm output tile
    s_ref, ss_ref : (1, Cp) f32 partial per-channel sum and sum of squares
                    (one distinct block per grid step -> no accumulation).
    """
    # PyTorch applies ReLU to x before the transposed conv; zero padding is a
    # fixed point of ReLU, so applying it to the gathered taps is equivalent.
    p = jnp.maximum(p_ref[...], 0)
    y = jnp.dot(p, w_ref[...], preferred_element_type=jnp.float32)
    y_ref[...] = y.astype(y_ref.dtype)
    s_ref[...] = jnp.sum(y, axis=0, keepdims=True)
    ss_ref[...] = jnp.sum(y * y, axis=0, keepdims=True)


def _affine_kernel(y_ref, sc_ref, sh_ref, o_ref):
    """Pass 2 of BatchNorm: per-channel y * scale + shift (f32 output)."""
    o_ref[...] = y_ref[...].astype(jnp.float32) * sc_ref[...] + sh_ref[...]


def _mm_act_kernel(p_ref, w_ref, b_ref, o_ref, *, act):
    """Outermost branch: phase matmul + bias + tanh/sigmoid (no ReLU)."""
    y = jnp.dot(p_ref[...], w_ref[...], preferred_element_type=jnp.float32)
    y = y + b_ref[...]
    o_ref[...] = jnp.tanh(y) if act == "tanh" else jax.nn.sigmoid(y)


# ------------------------------ wrapper glue --------------------------------


def _phase_decompose(x_nhwc, weight_t):
    """Rewrite ConvTranspose2d(k=4, s=2, p=1) as 4 dense per-parity 2x2 convs.

    Returns patches (4, N*H*W, 4*Cin) and weights (4, 4*Cin, Cout); phase
    index = 2*parity_h + parity_w.
    """
    N, H, W, Cin = x_nhwc.shape
    xp = jnp.pad(x_nhwc, ((0, 0), (1, 1), (1, 1), (0, 0)))
    patches, weights = [], []
    for ph in (0, 1):
        for pw in (0, 1):
            cols, wrows = [], []
            for kh, dh in _TAPS[ph]:
                for kw, dw in _TAPS[pw]:
                    cols.append(xp[:, dh + 1:dh + 1 + H, dw + 1:dw + 1 + W, :])
                    wrows.append(weight_t[:, :, kh, kw])        # (Cin, Cout)
            patches.append(
                jnp.concatenate(cols, axis=-1).reshape(N * H * W, 4 * Cin))
            weights.append(jnp.concatenate(wrows, axis=0))      # (4*Cin, Cout)
    return jnp.stack(patches), jnp.stack(weights)


def _row_tile(R, Kc, Cp):
    """Largest sublane/MXU-aligned row tile whose double-buffered working set
    (for both the matmul pass and the affine pass) stays inside a conservative
    VMEM budget, after reserving space for the resident phase weights."""
    w_bytes = 2 * Kc * Cp * 2                      # double-buffered bf16 weights
    budget = max(2 * 1024 * 1024, 16 * 1024 * 1024 - w_bytes)
    kc_vmem = max(-(-Kc // LANES) * LANES, LANES)  # lane padding of patch tile
    per_row = max(2 * (kc_vmem * 2 + Cp * 4),      # matmul pass (f32-out worst case)
                  2 * (Cp * 2 + Cp * 4))           # affine pass (bf16 in + f32 out)
    tr = max(8, min(1024, budget // max(per_row, 1)))
    if R <= tr:
        tr = -(-R // 8) * 8                        # single sublane-aligned tile
    elif tr >= 128:
        tr = (tr // 128) * 128                     # keep the MXU M dim 128-aligned
    else:
        tr = (tr // 8) * 8
    r_pad = -(-R // tr) * tr
    return tr, r_pad
# TODO(synk): for very large Cin (Kc * TR exceeding the VMEM budget) add a K
# grid axis with an f32 accumulator scratch instead of shrinking TR further.


@functools.partial(jax.jit, static_argnames=("outermost", "innermost", "is_seg"))
def decode_block_forward(x, weight_t, bias, gamma=None, beta=None, *,
                         outermost=False, innermost=False, is_seg=False):
    """Forward pass of DecodeBlock.

    x        : (N, Cin, H, W)  NCHW, like the PyTorch module
    weight_t : (Cin, Cout, 4, 4)  nn.ConvTranspose2d weight layout
    bias     : (Cout,);  gamma/beta: (Cout,) BatchNorm affine (non-outermost)
    Returns  : (N, Cout, 2H, 2W)
    """
    del innermost  # identical compute path; Cin is taken from weight_t
    N, Cin, H, W = x.shape
    Cout = weight_t.shape[1]
    Ho, Wo = 2 * H, 2 * W

    # Cast to bf16 early: halves the HBM traffic of patch construction and the
    # MXU operands are bf16 anyway.
    x_nhwc = jnp.transpose(x, (0, 2, 3, 1)).astype(jnp.bfloat16)
    P, Wm = _phase_decompose(x_nhwc, weight_t.astype(jnp.bfloat16))

    R, Kc = N * H * W, 4 * Cin
    Cp = -(-Cout // LANES) * LANES            # lane-dense channel dim
    TR, R_pad = _row_tile(R, Kc, Cp)
    n_rt = R_pad // TR

    P = jnp.pad(P, ((0, 0), (0, R_pad - R), (0, 0)))
    Wm = jnp.pad(Wm, ((0, 0), (0, 0), (0, Cp - Cout)))

    p_spec = pl.BlockSpec((None, TR, Kc), lambda p, r: (p, r, 0))
    w_spec = pl.BlockSpec((None, Kc, Cp), lambda p, r: (p, 0, 0))
    y_spec = pl.BlockSpec((None, TR, Cp), lambda p, r: (p, r, 0))
    vec_spec = pl.BlockSpec((1, Cp), lambda p, r: (0, 0))
    stat_spec = pl.BlockSpec((None, None, 1, Cp), lambda p, r: (p, r, 0, 0))
    grid = (4, n_rt)

    mm_flops = 2 * 4 * R_pad * Kc * Cp
    mm_bytes = 4 * R_pad * Kc * 2 + 4 * Kc * Cp * 2 + 4 * R_pad * Cp * 2

    if outermost:
        b2d = jnp.pad(bias.astype(jnp.float32), (0, Cp - Cout)).reshape(1, Cp)
        act = "sigmoid" if is_seg else "tanh"
        out_all = pl.pallas_call(
            functools.partial(_mm_act_kernel, act=act),
            out_shape=jax.ShapeDtypeStruct((4, R_pad, Cp), jnp.float32),
            grid=grid,
            in_specs=[p_spec, w_spec, vec_spec],
            out_specs=y_spec,
            compiler_params=pltpu.CompilerParams(
                dimension_semantics=("parallel", "parallel"),
                vmem_limit_bytes=_VMEM_LIMIT),
            cost_estimate=pl.CostEstimate(
                flops=mm_flops, transcendentals=4 * R_pad * Cp,
                bytes_accessed=4 * R_pad * Kc * 2 + 4 * Kc * Cp * 2
                + 4 * R_pad * Cp * 4 + Cp * 4),
        )(P, Wm, b2d)
    else:
        # Pass 1: matmul tiles (bf16 intermediate) + per-tile partial BN stats.
        # The conv bias is skipped: BatchNorm's mean subtraction cancels it.
        y_all, s_part, ss_part = pl.pallas_call(
            _mm_bn_stats_kernel,
            out_shape=(jax.ShapeDtypeStruct((4, R_pad, Cp), jnp.bfloat16),
                       jax.ShapeDtypeStruct((4, n_rt, 1, Cp), jnp.float32),
                       jax.ShapeDtypeStruct((4, n_rt, 1, Cp), jnp.float32)),
            grid=grid,
            in_specs=[p_spec, w_spec],
            out_specs=(y_spec, stat_spec, stat_spec),
            compiler_params=pltpu.CompilerParams(
                dimension_semantics=("parallel", "parallel"),
                vmem_limit_bytes=_VMEM_LIMIT),
            cost_estimate=pl.CostEstimate(
                flops=mm_flops, transcendentals=0,
                bytes_accessed=mm_bytes + 2 * 4 * n_rt * Cp * 4),
        )(P, Wm)

        # Finish the tiny per-channel BN scale/shift in JAX.  Zero-padded rows
        # contribute exact zeros, so dividing by the true count is exact.
        cnt = jnp.float32(N * Ho * Wo)
        s = jnp.sum(s_part, axis=(0, 1, 2))
        ss = jnp.sum(ss_part, axis=(0, 1, 2))
        mean = s / cnt
        var = jnp.maximum(ss / cnt - mean * mean, 0.0)        # biased variance
        g = jnp.pad(gamma.astype(jnp.float32), (0, Cp - Cout))
        b = jnp.pad(beta.astype(jnp.float32), (0, Cp - Cout))
        inv = jax.lax.rsqrt(var + EPS)
        scale = (g * inv).reshape(1, Cp)
        shift = (b - mean * g * inv).reshape(1, Cp)

        # Pass 2: tiled, fully parallel elementwise BN affine (f32 output).
        out_all = pl.pallas_call(
            _affine_kernel,
            out_shape=jax.ShapeDtypeStruct((4, R_pad, Cp), jnp.float32),
            grid=grid,
            in_specs=[y_spec, vec_spec, vec_spec],
            out_specs=pl.BlockSpec((None, TR, Cp), lambda p, r: (p, r, 0)),
            compiler_params=pltpu.CompilerParams(
                dimension_semantics=("parallel", "parallel"),
                vmem_limit_bytes=_VMEM_LIMIT),
            cost_estimate=pl.CostEstimate(
                flops=2 * 4 * R_pad * Cp, transcendentals=0,
                bytes_accessed=4 * R_pad * Cp * (2 + 4) + 2 * Cp * 4),
        )(y_all, scale, shift)
    # TODO(synk): BatchNorm2d running_mean/running_var buffer updates (a
    # training-time side effect) are not reproduced; the output ignores them.

    # Un-pad and pixel-shuffle the 4 parity phases back into (N, Cout, 2H, 2W).
    out = out_all[:, :R, :Cout].reshape(2, 2, N, H, W, Cout)
    out = jnp.transpose(out, (2, 3, 0, 4, 1, 5)).reshape(N, Ho, Wo, Cout)
    return jnp.transpose(out, (0, 3, 1, 2))   # back to NCHW


# ------------------------------ test helpers --------------------------------


def init_decode_block_params(key, in_ch, out_ch):
    """Deterministic synthetic parameters with the shapes from __init__."""
    k_w, k_b, k_g, k_be = jax.random.split(key, 4)
    scale = 1.0 / jnp.sqrt(jnp.float32(in_ch * K * K))
    weight_t = jax.random.normal(k_w, (in_ch, out_ch, K, K), jnp.float32) * scale
    bias = jax.random.normal(k_b, (out_ch,), jnp.float32) * scale
    gamma = 1.0 + 0.1 * jax.random.normal(k_g, (out_ch,), jnp.float32)
    beta = 0.1 * jax.random.normal(k_be, (out_ch,), jnp.float32)
    return weight_t, bias, gamma, beta


def _reference_forward(x, weight_t, bias, gamma=None, beta=None, *,
                       outermost=False, is_seg=False):
    """Pure-JAX f32 reference (dilated conv formulation of the transposed conv)."""
    w_oihw = jnp.transpose(weight_t[:, :, ::-1, ::-1], (1, 0, 2, 3))
    xin = x if outermost else jax.nn.relu(x)
    y = jax.lax.conv_general_dilated(
        xin.astype(jnp.float32), w_oihw.astype(jnp.float32),
        window_strides=(1, 1), padding=((2, 2), (2, 2)), lhs_dilation=(2, 2),
        dimension_numbers=("NCHW", "OIHW", "NCHW"),
        precision=jax.lax.Precision.HIGHEST)
    y = y + bias.reshape(1, -1, 1, 1)
    if outermost:
        return jax.nn.sigmoid(y) if is_seg else jnp.tanh(y)
    mean = jnp.mean(y, axis=(0, 2, 3), keepdims=True)
    var = jnp.mean((y - mean) ** 2, axis=(0, 2, 3), keepdims=True)
    return ((y - mean) * jax.lax.rsqrt(var + EPS) * gamma.reshape(1, -1, 1, 1)
            + beta.reshape(1, -1, 1, 1))


if __name__ == "__main__":
    key = jax.random.PRNGKey(0)
    k_x, k_mid, k_out = jax.random.split(key, 3)

    inner_nc, outer_nc = 4, 4
    N, H, W = 2, 8, 8

    # Intermediate DecodeBlock: ReLU -> ConvTranspose2d(inner_nc*2 -> outer_nc)
    # -> BatchNorm2d (the innermost branch is identical compute with
    # in_channels = inner_nc instead of inner_nc*2).
    x = jax.random.normal(k_x, (N, inner_nc * 2, H, W), jnp.float32)
    w_t, b, g, be = init_decode_block_params(k_mid, inner_nc * 2, outer_nc)
    y_mid = jax.block_until_ready(decode_block_forward(x, w_t, b, g, be))
    assert y_mid.shape == (N, outer_nc, 2 * H, 2 * W)
    assert bool(jnp.all(jnp.isfinite(y_mid)))
    ref_mid = _reference_forward(x, w_t, b, g, be)
    assert float(jnp.max(jnp.abs(y_mid - ref_mid))) < 1e-1

    # Outermost DecodeBlock: ConvTranspose2d -> Tanh (is_seg=False).
    w_t2, b2, _, _ = init_decode_block_params(k_out, inner_nc * 2, outer_nc)
    y_out = jax.block_until_ready(
        decode_block_forward(x, w_t2, b2, outermost=True, is_seg=False))
    assert y_out.shape == (N, outer_nc, 2 * H, 2 * W)
    assert bool(jnp.all(jnp.isfinite(y_out)))
    ref_out = _reference_forward(x, w_t2, b2, outermost=True, is_seg=False)
    assert float(jnp.max(jnp.abs(y_out - ref_out))) < 1e-1

    print("KERNEL_OK")
</pallas_src>

<mosaic_0001>
module attributes {stable_mosaic.version = 11 : i64} {
  func.func @_mm_bn_stats_kernel(%arg0: i32, %arg1: i32, %arg2: memref<1x128x32xbf16, #tpu.memory_space<vmem>>, %arg3: memref<1x32x128xbf16, #tpu.memory_space<vmem>>, %arg4: memref<1x128x128xbf16, #tpu.memory_space<vmem>>, %arg5: memref<1x1x1x128xf32, #tpu.memory_space<vmem>>, %arg6: memref<1x1x1x128xf32, #tpu.memory_space<vmem>>) attributes {dimension_semantics = [#tpu.dimension_semantics<parallel>, #tpu.dimension_semantics<parallel>], iteration_bounds = array<i64: 4, 1>, scalar_prefetch = 0 : i64, scratch_operands = 0 : i64, tpu.core_type = #tpu.core_type<tc>, window_params = [{transform_indices = @transform_0, window_bounds = array<i64: 1, 128, 32>}, {transform_indices = @transform_1, window_bounds = array<i64: 1, 32, 128>}, {transform_indices = @transform_2, window_bounds = array<i64: 1, 128, 128>}, {transform_indices = @transform_3, window_bounds = array<i64: 1, 1, 1, 128>}, {transform_indices = @transform_4, window_bounds = array<i64: 1, 1, 1, 128>}]} {
    %c0 = arith.constant 0 : index
    %c0_0 = arith.constant 0 : index
    %c0_1 = arith.constant 0 : index
    %0 = vector.load %arg2[%c0, %c0_0, %c0_1] : memref<1x128x32xbf16, #tpu.memory_space<vmem>>, vector<1x128x32xbf16>
    %1 = vector.shape_cast %0 : vector<1x128x32xbf16> to vector<128x32xbf16>
    %cst = arith.constant 0.000000e+00 : bf16
    %2 = vector.broadcast %cst : bf16 to vector<128x32xbf16>
    %3 = arith.maximumf %1, %2 : vector<128x32xbf16>
    %c0_2 = arith.constant 0 : index
    %c0_3 = arith.constant 0 : index
    %c0_4 = arith.constant 0 : index
    %4 = vector.load %arg3[%c0_2, %c0_3, %c0_4] : memref<1x32x128xbf16, #tpu.memory_space<vmem>>, vector<1x32x128xbf16>
    %5 = vector.shape_cast %4 : vector<1x32x128xbf16> to vector<32x128xbf16>
    %cst_5 = arith.constant dense<0.000000e+00> : vector<128x128xf32>
    %6 = tpu.matmul %3, %5, %cst_5 {dimension_numbers = #tpu.dot_dimension_numbers<[1], [0], [0], [1], [0, 0, 1, 1], [], []>} : vector<128x32xbf16>, vector<32x128xbf16>, vector<128x128xf32> -> vector<128x128xf32>
    %7 = arith.truncf %6 : vector<128x128xf32> to vector<128x128xbf16>
    %c0_6 = arith.constant 0 : index
    %c0_7 = arith.constant 0 : index
    %c0_8 = arith.constant 0 : index
    %8 = vector.load %arg4[%c0_6, %c0_7, %c0_8] : memref<1x128x128xbf16, #tpu.memory_space<vmem>>, vector<1x128x128xbf16>
    %9 = vector.shape_cast %8 : vector<1x128x128xbf16> to vector<128x128xbf16>
    %10 = vector.shape_cast %7 : vector<128x128xbf16> to vector<1x128x128xbf16>
    tpu.vector_store %arg4[%c0_6, %c0_7, %c0_8], %10 {strides = array<i32>} : memref<1x128x128xbf16, #tpu.memory_space<vmem>>, vector<1x128x128xbf16>,
    %cst_9 = arith.constant dense<0.000000e+00> : vector<128xf32>
    %11 = vector.multi_reduction <add>, %6, %cst_9 [0] : vector<128x128xf32> to vector<128xf32>
    %12 = vector.shape_cast %11 : vector<128xf32> to vector<1x128xf32>
    %c0_10 = arith.constant 0 : index
    %c0_11 = arith.constant 0 : index
    %c0_12 = arith.constant 0 : index
    %c0_13 = arith.constant 0 : index
    %13 = vector.load %arg5[%c0_10, %c0_11, %c0_12, %c0_13] : memref<1x1x1x128xf32, #tpu.memory_space<vmem>>, vector<1x1x1x128xf32>
    %14 = vector.shape_cast %13 : vector<1x1x1x128xf32> to vector<1x128xf32>
    %15 = vector.shape_cast %12 : vector<1x128xf32> to vector<1x1x1x128xf32>
    tpu.vector_store %arg5[%c0_10, %c0_11, %c0_12, %c0_13], %15 {strides = array<i32>} : memref<1x1x1x128xf32, #tpu.memory_space<vmem>>, vector<1x1x1x128xf32>,
    %16 = arith.mulf %6, %6 : vector<128x128xf32>
    %cst_14 = arith.constant dense<0.000000e+00> : vector<128xf32>
    %17 = vector.multi_reduction <add>, %16, %cst_14 [0] : vector<128x128xf32> to vector<128xf32>
    %18 = vector.shape_cast %17 : vector<128xf32> to vector<1x128xf32>
    %c0_15 = arith.constant 0 : index
    %c0_16 = arith.constant 0 : index
    %c0_17 = arith.constant 0 : index
    %c0_18 = arith.constant 0 : index
    %19 = vector.load %arg6[%c0_15, %c0_16, %c0_17, %c0_18] : memref<1x1x1x128xf32, #tpu.memory_space<vmem>>, vector<1x1x1x128xf32>
    %20 = vector.shape_cast %19 : vector<1x1x1x128xf32> to vector<1x128xf32>
    %21 = vector.shape_cast %18 : vector<1x128xf32> to vector<1x1x1x128xf32>
    tpu.vector_store %arg6[%c0_15, %c0_16, %c0_17, %c0_18], %21 {strides = array<i32>} : memref<1x1x1x128xf32, #tpu.memory_space<vmem>>, vector<1x1x1x128xf32>,
    return
  }
  func.func @transform_0(%arg0: i32, %arg1: i32) -> (i32, i32, i32) {
    %c0_i32 = arith.constant 0 : i32
    %c0_i32_0 = arith.constant 0 : i32
    return %arg0, %arg1, %c0_i32 : i32, i32, i32
  }
  func.func @transform_1(%arg0: i32, %arg1: i32) -> (i32, i32, i32) {
    %c0_i32 = arith.constant 0 : i32
    %c0_i32_0 = arith.constant 0 : i32
    %c0_i32_1 = arith.constant 0 : i32
    return %arg0, %c0_i32, %c0_i32_0 : i32, i32, i32
  }
  func.func @transform_2(%arg0: i32, %arg1: i32) -> (i32, i32, i32) {
    %c0_i32 = arith.constant 0 : i32
    %c0_i32_0 = arith.constant 0 : i32
    return %arg0, %arg1, %c0_i32 : i32, i32, i32
  }
  func.func @transform_3(%arg0: i32, %arg1: i32) -> (i32, i32, i32, i32) {
    %c0_i32 = arith.constant 0 : i32
    %c0_i32_0 = arith.constant 0 : i32
    %c0_i32_1 = arith.constant 0 : i32
    return %arg0, %arg1, %c0_i32, %c0_i32_0 : i32, i32, i32, i32
  }
  func.func @transform_4(%arg0: i32, %arg1: i32) -> (i32, i32, i32, i32) {
    %c0_i32 = arith.constant 0 : i32
    %c0_i32_0 = arith.constant 0 : i32
    %c0_i32_1 = arith.constant 0 : i32
    return %arg0, %arg1, %c0_i32, %c0_i32_0 : i32, i32, i32, i32
  }
}

module attributes {stable_mosaic.version = 11 : i64} {
  func.func @_affine_kernel(%arg0: i32, %arg1: i32, %arg2: memref<1x128x128xbf16, #tpu.memory_space<vmem>>, %arg3: memref<1x128xf32, #tpu.memory_space<vmem>>, %arg4: memref<1x128xf32, #tpu.memory_space<vmem>>, %arg5: memref<1x128x128xf32, #tpu.memory_space<vmem>>) attributes {dimension_semantics = [#tpu.dimension_semantics<parallel>, #tpu.dimension_semantics<parallel>], iteration_bounds = array<i64: 4, 1>, scalar_prefetch = 0 : i64, scratch_operands = 0 : i64, tpu.core_type = #tpu.core_type<tc>, window_params = [{transform_indices = @transform_0, window_bounds = array<i64: 1, 128, 128>}, {pipeline_mode = #tpu.pipeline_mode<synchronous>, transform_indices = @transform_1, window_bounds = array<i64: 1, 128>}, {pipeline_mode = #tpu.pipeline_mode<synchronous>, transform_indices = @transform_2, window_bounds = array<i64: 1, 128>}, {transform_indices = @transform_3, window_bounds = array<i64: 1, 128, 128>}]} {
    %c0 = arith.constant 0 : index
    %c0_0 = arith.constant 0 : index
    %c0_1 = arith.constant 0 : index
    %0 = vector.load %arg2[%c0, %c0_0, %c0_1] : memref<1x128x128xbf16, #tpu.memory_space<vmem>>, vector<1x128x128xbf16>
    %1 = vector.shape_cast %0 : vector<1x128x128xbf16> to vector<128x128xbf16>
    %2 = arith.extf %1 : vector<128x128xbf16> to vector<128x128xf32>
    %c0_2 = arith.constant 0 : index
    %c0_3 = arith.constant 0 : index
    %3 = vector.load %arg3[%c0_2, %c0_3] : memref<1x128xf32, #tpu.memory_space<vmem>>, vector<1x128xf32>
    %4 = vector.broadcast %3 : vector<1x128xf32> to vector<128x128xf32>
    %5 = arith.mulf %2, %4 : vector<128x128xf32>
    %c0_4 = arith.constant 0 : index
    %c0_5 = arith.constant 0 : index
    %6 = vector.load %arg4[%c0_4, %c0_5] : memref<1x128xf32, #tpu.memory_space<vmem>>, vector<1x128xf32>
    %7 = vector.broadcast %6 : vector<1x128xf32> to vector<128x128xf32>
    %8 = arith.addf %5, %7 : vector<128x128xf32>
    %c0_6 = arith.constant 0 : index
    %c0_7 = arith.constant 0 : index
    %c0_8 = arith.constant 0 : index
    %9 = vector.load %arg5[%c0_6, %c0_7, %c0_8] : memref<1x128x128xf32, #tpu.memory_space<vmem>>, vector<1x128x128xf32>
    %10 = vector.shape_cast %9 : vector<1x128x128xf32> to vector<128x128xf32>
    %11 = vector.shape_cast %8 : vector<128x128xf32> to vector<1x128x128xf32>
    tpu.vector_store %arg5[%c0_6, %c0_7, %c0_8], %11 {strides = array<i32>} : memref<1x128x128xf32, #tpu.memory_space<vmem>>, vector<1x128x128xf32>,
    return
  }
  func.func @transform_0(%arg0: i32, %arg1: i32) -> (i32, i32, i32) {
    %c0_i32 = arith.constant 0 : i32
    %c0_i32_0 = arith.constant 0 : i32
    return %arg0, %arg1, %c0_i32 : i32, i32, i32
  }
  func.func @transform_1(%arg0: i32, %arg1: i32) -> (i32, i32) {
    %c0_i32 = arith.constant 0 : i32
    %c0_i32_0 = arith.constant 0 : i32
    %c0_i32_1 = arith.constant 0 : i32
    return %c0_i32, %c0_i32_0 : i32, i32
  }
  func.func @transform_2(%arg0: i32, %arg1: i32) -> (i32, i32) {
    %c0_i32 = arith.constant 0 : i32
    %c0_i32_0 = arith.constant 0 : i32
    %c0_i32_1 = arith.constant 0 : i32
    return %c0_i32, %c0_i32_0 : i32, i32
  }
  func.func @transform_3(%arg0: i32, %arg1: i32) -> (i32, i32, i32) {
    %c0_i32 = arith.constant 0 : i32
    %c0_i32_0 = arith.constant 0 : i32
    return %arg0, %arg1, %c0_i32 : i32, i32, i32
  }
}

</mosaic_0001>

<bundles_post_ra>
// kernel: decode_block_forward.2
= control target key start
LH: loop header
LB: loop body
LE: loop exit
PB: predicated region body
PF: predicated region fallthrough
CT: control target
= control target key end

     0   :  { %s1034_s15 = smov 0   ;;  %s1036_s16 = smov 0   ;;  %s1122_s0 = inlined_call_operand.vmem [shape: bf16[4,128,32], index: 0, kind: input, shape index: {}]   ;;  %s1123_s1 = inlined_call_operand.vmem [shape: bf16[4,32,128], index: 1, kind: input, shape index: {}]   ;;  %s1124_s2 = inlined_call_operand.vmem [shape: bf16[4,128,128], index: 2, kind: output, shape index: {0}]   ;;  %s1125_s3 = inlined_call_operand.vmem [shape: f32[4,1,1,128], index: 3, kind: output, shape index: {1}]   ;;  %s1126_s4 = inlined_call_operand.vmem [shape: f32[4,1,1,128], index: 4, kind: output, shape index: {2}]  }
   0x1   :  { %s1038_s17 = smov 0  }
   0x2 LB: > { %s27_s18 = sadd.s32 1, %s1002_s16  ;;  %p814_p0 = scmp.ge.s32.totalorder %s1006_s17, 1  ;;  %s1006_s17 = sphi %s1038_s17, %s15_s17   ;;  %s1002_s16 = sphi %s1036_s16, %s1128_s16   ;;  %s998_s15 = sphi %s1034_s15, %s1127_s15  }
   0x3   : > { %p29_p1 = scmp.ge.s32.totalorder %s27_s18, 4  ;;  %p202_p2 = scmp.lt.s32.totalorder %s1006_s17, 5 }
   0x5   : > { %s1130_s18 = smov (%p29_p1, %s27_s18), 0  ;;  %p203_p3 = pnand %p814_p0, %p202_p2 }
   0x6   : > { %p254_p4 = scmp.lt.s32.totalorder (!%p203_p3), %s998_s15, 3  ;;  %v1008_v5 = vmov (!%p203_p3), 0   ;;  %vm379_vm0 = vcmask (!%p203_p3), 261120  }
   0x7   : > { %206 = sbr.rel (%p203_p3) target bundleno = 286 (0x11e), region = 28 }
   0xe   : > { %s1132_s15 = smov (!%p254_p4, %s998_s15), 3 }
   0xf   : > { %s857_s19 = sshll.u32 %s1132_s15, 6  ;;  %s858_s20 = sshll.u32 %s1132_s15, 4 }
  0x10   : > { %s1061_s23 = scalar_lea.vmem %s1122_s0, %s857_s19  ;;  %s267_s26 = scalar_lea.vmem %s1123_s1, %s858_s20 }
  0x11   : > { %v982_v0 = vld [vmem:[%s267_s26] sm:$0xff]   ;;  %v983_v1 = vld [vmem:[%s267_s26 + $0x8] sm:$0xff]   ;;  %v295_v10 = vld [vmem:[%s1061_s23 + $0x10] sm:$0xf]  ;;  %s1095_s29 = scalar_lea.vmem %s1124_s2, %s857_s19  ;;  %s283_s6 = scalar_lea.vmem %s1125_s3, %s1132_s15 }
  0x12   : > { %933 = vmatprep.subr.bf16.mxu0 %v982_v0  ;;  %v291_v2 = vld [vmem:[%s1061_s23] sm:$0xf]  ;;  %v292_v3 = vld [vmem:[%s1061_s23 + $0x4] sm:$0xf]  ;;  %v293_v4 = vld [vmem:[%s1061_s23 + $0x8] sm:$0xf]  ;;  %953 = vmatprep.subr.bf16.mxu1 %v982_v0  ;;  %v311_v13 = vmax.bf16 %v1008_v5, %v295_v10  ;;  %s289_s9 = scalar_lea.vmem %s1126_s4, %s1132_s15 }
  0x13   : > { %934 = vmatpush3.bf16.msra.mxu0 %v982_v0  ;;  %v307_v6 = vmax.bf16 %v1008_v5, %v291_v2  ;;  %v308_v7 = vmax.bf16 %v1008_v5, %v292_v3  ;;  %v294_v8 = vld [vmem:[%s1061_s23 + $0xc] sm:$0xf]  ;;  %v309_v9 = vmax.bf16 %v1008_v5, %v293_v4  ;;  %955 = vmatpush3.bf16.msra.mxu1 %v982_v0  ;;  %v296_v11 = vld [vmem:[%s1061_s23 + $0x14] sm:$0xf]  ;;  %v299_v15 = vld [vmem:[%s1061_s23 + $0x20] sm:$0xf] }
  0x14   : > { %935 = vmatprep.subr.bf16.mxu0 %v983_v1  ;;  %v310_v12 = vmax.bf16 %v1008_v5, %v294_v8  ;;  %v312_v14 = vmax.bf16 %v1008_v5, %v296_v11  ;;  %954 = vmatprep.subr.bf16.mxu1 %v983_v1  ;;  %v300_v17 = vld [vmem:[%s1061_s23 + $0x24] sm:$0xf]  ;;  %v315_v18 = vmax.bf16 %v1008_v5, %v299_v15  ;;  %v301_v19 = vld [vmem:[%s1061_s23 + $0x28] sm:$0xf]  ;;  %v302_v20 = vld [vmem:[%s1061_s23 + $0x2c] sm:$0xf] }
  0x15   : > { %v821_v16 = vcombine.low %v307_v6, %v308_v7  ;;  %v316_v22 = vmax.bf16 %v1008_v5, %v300_v17  ;;  %v317_v23 = vmax.bf16 %v1008_v5, %v301_v19  ;;  %v303_v24 = vld [vmem:[%s1061_s23 + $0x30] sm:$0xf]  ;;  %v304_v25 = vld [vmem:[%s1061_s23 + $0x34] sm:$0xf]  ;;  %v297_v27 = vld [vmem:[%s1061_s23 + $0x18] sm:$0xf]  ;;  %v318_v29 = vmax.bf16 %v1008_v5, %v302_v20 }
  0x16   : > { %v822_v21 = vcombine.low %v309_v9, %v310_v12  ;;  %v823_v26 = vcombine.low %v311_v13, %v312_v14  ;;  %v298_v28 = vld [vmem:[%s1061_s23 + $0x1c] sm:$0xf]  ;;  %v319_v30 = vmax.bf16 %v1008_v5, %v303_v24  ;;  %v320_v32 = vmax.bf16 %v1008_v5, %v304_v25  ;;  %v305_v33 = vld [vmem:[%s1061_s23 + $0x38] sm:$0xf] }
  0x17   : > { %936 = vmatpush3.bf16.msra.mxu0 %v983_v1  ;;  %937 = vmatprep.mubr.msk.bf16.mxu0 %vm379_vm0, %v821_v16  ;;  %v825_v31 = vcombine.low %v315_v18, %v316_v22  ;;  %v306_v34 = vld [vmem:[%s1061_s23 + $0x3c] sm:$0xf]  ;;  %v826_v35 = vcombine.low %v317_v23, %v318_v29  ;;  %v313_v36 = vmax.bf16 %v1008_v5, %v297_v27 }
  0x18   : > { %956 = vmatpush3.bf16.msra.mxu1 %v983_v1  ;;  %v314_v37 = vmax.bf16 %v1008_v5, %v298_v28  ;;  %v827_v38 = vcombine.low %v319_v30, %v320_v32  ;;  %v321_v39 = vmax.bf16 %v1008_v5, %v305_v33  ;;  %v322_v40 = vmax.bf16 %v1008_v5, %v306_v34 }
  0x19   : > { %945 = vmatprep.mubr.msk.bf16.mxu1 %vm379_vm0, %v825_v31 }
  0x1a   : > { %938 = vmatmul.mubr.msk.bf16.vlgmr.msra.gmra.mrb[0].mxu0 %vm379_vm0, %v822_v21  ;;  %v824_v41 = vcombine.low %v313_v36, %v314_v37  ;;  %v828_v42 = vcombine.low %v321_v39, %v322_v40 }
  0x1b   : > { %941 = vmatprep.mubr.msk.bf16.mxu0 %vm379_vm0, %v823_v26  ;;  %946 = vmatmul.mubr.msk.bf16.vlgmr.msra.gmra.mrb[0].mxu1 %vm379_vm0, %v826_v35 }
  0x1c   : > { %949 = vmatprep.mubr.msk.bf16.mxu1 %vm379_vm0, %v827_v38 }
  0x22   : > { %942 = vmatmul.mubr.msk.bf16.gmra.mrb[4].mxu0 %vm379_vm0, %v824_v41 }
  0x23   : > { %950 = vmatmul.mubr.msk.bf16.gmra.mrb[4].mxu1 %vm379_vm0, %v828_v42 }
  0xed   : > { %v939_v43 = vpop.f32.mrb[0].mxu0 }
  0xee   : > { %v438_v44 = vpop.f32.mrb[1].mxu0  ;;  %v947_v45 = vpop.f32.mrb[0].mxu1  ;;  %v605_v58 = vmul.f32 %v939_v43, %v939_v43 }
  0xef   : > { %v940_v46 = vpop.f32.mrb[2].mxu0  ;;  %v470_v47 = vpop.f32.mrb[1].mxu1  ;;  %v603_v48 = vmul.f32 %v438_v44, %v438_v44  ;;  %v613_v30 = vmul.f32 %v947_v45, %v947_v45 }
  0xf0   : > { %v884_v49 = vpack.c.bf16 %v940_v46, %v939_v43  ;;  %v441_v50 = vpop.f32.mrb[3].mxu0  ;;  %v948_v51 = vpop.f32.mrb[2].mxu1  ;;  %v606_v61 = vmul.f32 %v940_v46, %v940_v46  ;;  %v611_v24 = vmul.f32 %v470_v47, %v470_v47 }
  0xf1   : > { %v879_v52 = vpack.c.bf16 %v441_v50, %v438_v44  ;;  %v581_v53 = vadd.f32 %v441_v50, %v438_v44  ;;  %v604_v54 = vmul.f32 %v441_v50, %v441_v50  ;;  %v904_v55 = vpack.c.bf16 %v948_v51, %v947_v45  ;;  %v473_v56 = vpop.f32.mrb[3].mxu1 }
  0xf2   : > { %916 = vst [vmem:[%s1095_s29 + $0x8] sm:$0xff] %v884_v49   ;;  %v899_v57 = vpack.c.bf16 %v473_v56, %v470_v47  ;;  %v612_v29 = vmul.f32 %v473_v56, %v473_v56  ;;  %v614_v33 = vmul.f32 %v948_v51, %v948_v51 }
  0xf3   : > { %880 = vst [vmem:[%s1095_s29] sm:$0xff] %v879_v52   ;;  %v582_v59 = vadd.f32 %v939_v43, %v581_v53  ;;  %v619_v60 = vadd.f32 %v604_v54, %v603_v48  ;;  %920 = vst [vmem:[%s1095_s29 + $0x28] sm:$0xff] %v904_v55  }
  0xf4   : > { %919 = vst [vmem:[%s1095_s29 + $0x20] sm:$0xff] %v899_v57  }
  0xf5   : > { %v620_v62 = vadd.f32 %v619_v60, %v605_v58  ;;  %v943_v63 = vpop.f32.mrb[4].mxu0  ;;  %v583_v0 = vadd.f32 %v940_v46, %v582_v59 }
  0xf6   : > { %v454_v1 = vpop.f32.mrb[5].mxu0  ;;  %v951_v2 = vpop.f32.mrb[4].mxu1  ;;  %v609_v18 = vmul.f32 %v943_v63, %v943_v63 }
  0xf7   : > { %v584_v3 = vadd.f32 %v583_v0, %v454_v1  ;;  %v607_v4 = vmul.f32 %v454_v1, %v454_v1  ;;  %v621_v5 = vadd.f32 %v620_v62, %v606_v61  ;;  %v944_v6 = vpop.f32.mrb[6].mxu0  ;;  %v486_v7 = vpop.f32.mrb[5].mxu1  ;;  %v617_v42 = vmul.f32 %v951_v2, %v951_v2 }
  0xf8   : > { %v894_v8 = vpack.c.bf16 %v944_v6, %v943_v63  ;;  %v457_v9 = vpop.f32.mrb[7].mxu0  ;;  %v952_v10 = vpop.f32.mrb[6].mxu1  ;;  %v610_v21 = vmul.f32 %v944_v6, %v944_v6  ;;  %v615_v36 = vmul.f32 %v486_v7, %v486_v7 }
  0xf9   : > { %v622_v11 = vadd.f32 %v621_v5, %v607_v4  ;;  %v889_v12 = vpack.c.bf16 %v457_v9, %v454_v1  ;;  %v585_v13 = vadd.f32 %v584_v3, %v457_v9  ;;  %v608_v14 = vmul.f32 %v457_v9, %v457_v9  ;;  %v489_v15 = vpop.f32.mrb[7].mxu1 }
  0xfa   : > { %918 = vst [vmem:[%s1095_s29 + $0x18] sm:$0xff] %v894_v8   ;;  %v914_v16 = vpack.c.bf16 %v952_v10, %v951_v2  ;;  %v909_v17 = vpack.c.bf16 %v489_v15, %v486_v7  ;;  %v616_v41 = vmul.f32 %v489_v15, %v489_v15  ;;  %v618_v46 = vmul.f32 %v952_v10, %v952_v10 }
  0xfb   : > { %917 = vst [vmem:[%s1095_s29 + $0x10] sm:$0xff] %v889_v12   ;;  %v586_v19 = vadd.f32 %v943_v63, %v585_v13  ;;  %v623_v20 = vadd.f32 %v622_v11, %v608_v14 }
  0xfc   : > { %922 = vst [vmem:[%s1095_s29 + $0x38] sm:$0xff] %v914_v16   ;;  %921 = vst [vmem:[%s1095_s29 + $0x30] sm:$0xff] %v909_v17  }
  0xfd   : > { %v624_v22 = vadd.f32 %v623_v20, %v609_v18  ;;  %v587_v23 = vadd.f32 %v944_v6, %v586_v19 }
  0xff   : > { %v588_v25 = vadd.f32 %v587_v23, %v470_v47  ;;  %v625_v26 = vadd.f32 %v624_v22, %v610_v21 }
 0x101   : > { %v626_v27 = vadd.f32 %v625_v26, %v611_v24  ;;  %v589_v28 = vadd.f32 %v588_v25, %v473_v56 }
 0x103   : > { %v590_v31 = vadd.f32 %v947_v45, %v589_v28  ;;  %v627_v32 = vadd.f32 %v626_v27, %v612_v29 }
 0x105   : > { %v628_v34 = vadd.f32 %v627_v32, %v613_v30  ;;  %v591_v35 = vadd.f32 %v948_v51, %v590_v31 }
 0x107   : > { %v592_v37 = vadd.f32 %v591_v35, %v486_v7  ;;  %v629_v38 = vadd.f32 %v628_v34, %v614_v33 }
 0x109   : > { %v630_v39 = vadd.f32 %v629_v38, %v615_v36  ;;  %v593_v40 = vadd.f32 %v592_v37, %v489_v15 }
 0x10b   : > { %v594_v43 = vadd.f32 %v951_v2, %v593_v40  ;;  %v631_v44 = vadd.f32 %v630_v39, %v616_v41 }
 0x10d   : > { %v595_v47 = vadd.f32 %v952_v10, %v594_v43  ;;  %v632_v48 = vadd.f32 %v631_v44, %v617_v42 }
 0x10f   : > { %v596_v49 = vrot.slane %v595_v47, 4  ;;  %v633_v45 = vadd.f32 %v632_v48, %v618_v46 }
 0x111   : > { %v597_v50 = vadd.f32 %v596_v49, %v595_v47  ;;  %v634_v52 = vrot.slane %v633_v45, 4 }
 0x113   : > { %v598_v53 = vrot.slane %v597_v50, 2  ;;  %v635_v51 = vadd.f32 %v634_v52, %v633_v45 }
 0x115   : > { %v599_v54 = vadd.f32 %v598_v53, %v597_v50  ;;  %v636_v55 = vrot.slane %v635_v51, 2 }
 0x117   : > { %v600_v56 = vrot.slane %v599_v54, 1  ;;  %v637_v57 = vadd.f32 %v636_v55, %v635_v51 }
 0x119   : > { %v601_v58 = vadd.f32 %v600_v56, %v599_v54  ;;  %v638_v59 = vrot.slane %v637_v57, 1 }
 0x11b   : > { %602 = vst [vmem:[%s283_s6] sm:$0x1] %v601_v58  ;;  %v639_v60 = vadd.f32 %v638_v59, %v637_v57 }
 0x11d   : > { %640 = vst [vmem:[%s289_s9] sm:$0x1] %v639_v60 }
 0x11e PF: > { %s15_s17 = sadd.s32 1, %s1006_s17   ;;  %s1127_s15 = smov %s1002_s16 }
 0x11f   : > { %p12_p5 = scmp.ge.s32.totalorder %s15_s17, 6   ;;  %s1128_s16 = smov %s1130_s18 }
 0x121   :  { %14 = sbr.rel (!%p12_p5) target bundleno = 2 (0x2), region = 85 }

// kernel: decode_block_forward.3
= control target key start
LH: loop header
LB: loop body
LE: loop exit
PB: predicated region body
PF: predicated region fallthrough
CT: control target
= control target key end

     0   :  { %s513_s12 = smov 0   ;;  %s515_s13 = smov 0   ;;  %s580_s0 = inlined_call_operand.vmem [shape: bf16[4,128,128], index: 0, kind: input, shape index: {}]   ;;  %s581_s1 = inlined_call_operand.vmem [shape: f32[1,128], index: 1, kind: input, shape index: {}]   ;;  %s582_s2 = inlined_call_operand.vmem [shape: f32[1,128], index: 2, kind: input, shape index: {}]   ;;  %s583_s3 = inlined_call_operand.vmem [shape: f32[4,128,128], index: 3, kind: output, shape index: {}]  }
   0x1   :  { %s517_s14 = smov 0  }
   0x2 LB: > { %s25_s15 = sadd.s32 1, %s487_s13  ;;  %p395_p0 = scmp.ge.s32.totalorder %s491_s14, 1  ;;  %s491_s14 = sphi %s517_s14, %s13_s14   ;;  %s487_s13 = sphi %s515_s13, %s585_s13   ;;  %s483_s12 = sphi %s513_s12, %s584_s12  }
   0x3   : > { %p27_p1 = scmp.ge.s32.totalorder %s25_s15, 4  ;;  %p158_p2 = scmp.lt.s32.totalorder %s491_s14, 5 }
   0x5   : > { %s587_s15 = smov (%p27_p1, %s25_s15), 0  ;;  %p159_p3 = pnand %p395_p0, %p158_p2 }
   0x6   : > { %p191_p4 = scmp.lt.s32.totalorder (!%p159_p3), %s483_s12, 3  ;;  %v400_v0 = vld [vmem:[%s581_s1] ss:$0 sm:$0xff] (!%p159_p3) }
   0x7   : > { %162 = sbr.rel (%p159_p3) target bundleno = 34 (0x22), region = 32  ;;  %v401_v9 = vld [vmem:[%s582_s2] ss:$0 sm:$0xff] (!%p159_p3) }
   0xe   : > { %s589_s12 = smov (!%p191_p4, %s483_s12), 3 }
   0xf   : > { %s404_s16 = sshll.u32 %s589_s12, 6  ;;  %s405_s22 = sshll.u32 %s589_s12, 7 }
  0x10   : > { %s534_s19 = scalar_lea.vmem %s580_s0, %s404_s16  ;;  %s549_s27 = scalar_lea.vmem %s583_s3, %s405_s22 }
  0x11   : > { %v407_v1 = vld [vmem:[%s534_s19] sm:$0xff]   ;;  %v438_v2 = vld [vmem:[%s534_s19 + $0x8] sm:$0xff]   ;;  %v439_v3 = vld [vmem:[%s534_s19 + $0x10] sm:$0xff]  }
  0x12   : > { %v408_v4 = vunpack.c.l.bf16 %v407_v1  ;;  %v409_v5 = vunpack.c.h.bf16 %v407_v1  ;;  %v412_v6 = vunpack.c.l.bf16 %v438_v2  ;;  %v413_v7 = vunpack.c.h.bf16 %v438_v2  ;;  %v440_v8 = vld [vmem:[%s534_s19 + $0x18] sm:$0xff]   ;;  %v441_v22 = vld [vmem:[%s534_s19 + $0x20] sm:$0xff]   ;;  %v442_v23 = vld [vmem:[%s534_s19 + $0x28] sm:$0xff]  }
  0x13   : > { %v416_v10 = vunpack.c.l.bf16 %v439_v3  ;;  %v417_v11 = vunpack.c.h.bf16 %v439_v3  ;;  %v420_v12 = vunpack.c.l.bf16 %v440_v8  ;;  %v421_v13 = vunpack.c.h.bf16 %v440_v8  ;;  %v443_v28 = vld [vmem:[%s534_s19 + $0x30] sm:$0xff]   ;;  %v444_v29 = vld [vmem:[%s534_s19 + $0x38] sm:$0xff]  }
  0x14   : > { %v249_v14 = vmul.f32 %v408_v4, %v400_v0  ;;  %v250_v15 = vmul.f32 %v409_v5, %v400_v0  ;;  %v251_v16 = vmul.f32 %v412_v6, %v400_v0  ;;  %v252_v17 = vmul.f32 %v413_v7, %v400_v0 }
  0x15   : > { %v253_v18 = vmul.f32 %v416_v10, %v400_v0  ;;  %v254_v19 = vmul.f32 %v417_v11, %v400_v0  ;;  %v255_v20 = vmul.f32 %v420_v12, %v400_v0  ;;  %v256_v21 = vmul.f32 %v421_v13, %v400_v0 }
  0x16   : > { %v272_v24 = vadd.f32 %v401_v9, %v249_v14  ;;  %v273_v25 = vadd.f32 %v401_v9, %v250_v15  ;;  %v274_v26 = vadd.f32 %v401_v9, %v251_v16  ;;  %v275_v27 = vadd.f32 %v401_v9, %v252_v17 }
  0x17   : > { %v276_v30 = vadd.f32 %v401_v9, %v253_v18  ;;  %v277_v31 = vadd.f32 %v401_v9, %v254_v19  ;;  %v278_v32 = vadd.f32 %v401_v9, %v255_v20  ;;  %v279_v33 = vadd.f32 %v401_v9, %v256_v21 }
  0x18   : > { %288 = vst [vmem:[%s549_s27] sm:$0xff] %v272_v24  ;;  %289 = vst [vmem:[%s549_s27 + $0x8] sm:$0xff] %v273_v25  ;;  %v424_v34 = vunpack.c.l.bf16 %v441_v22  ;;  %v425_v35 = vunpack.c.h.bf16 %v441_v22  ;;  %v428_v36 = vunpack.c.l.bf16 %v442_v23  ;;  %v429_v37 = vunpack.c.h.bf16 %v442_v23 }
  0x19   : > { %290 = vst [vmem:[%s549_s27 + $0x10] sm:$0xff] %v274_v26  ;;  %291 = vst [vmem:[%s549_s27 + $0x18] sm:$0xff] %v275_v27  ;;  %v432_v38 = vunpack.c.l.bf16 %v443_v28  ;;  %v433_v39 = vunpack.c.h.bf16 %v443_v28  ;;  %v436_v40 = vunpack.c.l.bf16 %v444_v29  ;;  %v437_v41 = vunpack.c.h.bf16 %v444_v29 }
  0x1a   : > { %292 = vst [vmem:[%s549_s27 + $0x20] sm:$0xff] %v276_v30  ;;  %293 = vst [vmem:[%s549_s27 + $0x28] sm:$0xff] %v277_v31  ;;  %v257_v42 = vmul.f32 %v424_v34, %v400_v0  ;;  %v258_v43 = vmul.f32 %v425_v35, %v400_v0  ;;  %v259_v44 = vmul.f32 %v428_v36, %v400_v0 }
  0x1b   : > { %294 = vst [vmem:[%s549_s27 + $0x30] sm:$0xff] %v278_v32  ;;  %295 = vst [vmem:[%s549_s27 + $0x38] sm:$0xff] %v279_v33  ;;  %v260_v45 = vmul.f32 %v429_v37, %v400_v0  ;;  %v261_v46 = vmul.f32 %v432_v38, %v400_v0  ;;  %v262_v47 = vmul.f32 %v433_v39, %v400_v0 }
  0x1c   : > { %v263_v48 = vmul.f32 %v436_v40, %v400_v0  ;;  %v264_v49 = vmul.f32 %v437_v41, %v400_v0  ;;  %v280_v50 = vadd.f32 %v401_v9, %v257_v42  ;;  %v281_v51 = vadd.f32 %v401_v9, %v258_v43 }
  0x1d   : > { %v282_v52 = vadd.f32 %v401_v9, %v259_v44  ;;  %v283_v53 = vadd.f32 %v401_v9, %v260_v45  ;;  %v284_v54 = vadd.f32 %v401_v9, %v261_v46  ;;  %v285_v55 = vadd.f32 %v401_v9, %v262_v47 }
  0x1e   : > { %v286_v56 = vadd.f32 %v401_v9, %v263_v48  ;;  %v287_v57 = vadd.f32 %v401_v9, %v264_v49  ;;  %296 = vst [vmem:[%s549_s27 + $0x40] sm:$0xff] %v280_v50  ;;  %297 = vst [vmem:[%s549_s27 + $0x48] sm:$0xff] %v281_v51 }
  0x1f   : > { %298 = vst [vmem:[%s549_s27 + $0x50] sm:$0xff] %v282_v52  ;;  %299 = vst [vmem:[%s549_s27 + $0x58] sm:$0xff] %v283_v53 }
  0x20   : > { %300 = vst [vmem:[%s549_s27 + $0x60] sm:$0xff] %v284_v54  ;;  %301 = vst [vmem:[%s549_s27 + $0x68] sm:$0xff] %v285_v55 }
  0x21   : > { %302 = vst [vmem:[%s549_s27 + $0x70] sm:$0xff] %v286_v56  ;;  %303 = vst [vmem:[%s549_s27 + $0x78] sm:$0xff] %v287_v57 }
  0x22 PF: > { %s13_s14 = sadd.s32 1, %s491_s14   ;;  %s584_s12 = smov %s487_s13 }
  0x23   : > { %p10_p5 = scmp.ge.s32.totalorder %s13_s14, 6   ;;  %s585_s13 = smov %s587_s15 }
  0x25   :  { %12 = sbr.rel (!%p10_p5) target bundleno = 2 (0x2), region = 62 }

</bundles_post_ra>
